<compile_context>
chip_gen: v7x
topology: tpu7x:2x2x1
jax: 0.10.0
libtpu: 0.0.40
codegen_flags: <defaults>
</compile_context>

<pallas_src>
import jax
import jax.numpy as jnp
from jax.experimental import pallas as pl
from jax.experimental.pallas import tpu as pltpu


# ----------------------------------------------------------------------------
# Kernels
# ----------------------------------------------------------------------------
def _fuse_broadcast_kernel(x1_ref, x2_ref, o_ref):
    # x1_ref: (TR, TL) visual rows; x2_ref: (TR, 1) per-row language scalar.
    # (TR, 1) broadcasts across the lane axis -> one vmul per vreg.
    o_ref[...] = (x1_ref[...] * x2_ref[...]).astype(o_ref.dtype)


def _fuse_elementwise_kernel(x1_ref, x2_ref, o_ref):
    o_ref[...] = (x1_ref[...] * x2_ref[...]).astype(o_ref.dtype)


# ----------------------------------------------------------------------------
# Tiling helpers
# ----------------------------------------------------------------------------
def _tile(dim, target, align):
    """Largest tile <= target that is a multiple of `align`, or the full dim."""
    if dim <= target:
        return dim           # full extent is always a legal block dim
    return max(align, (target // align) * align)


_VMEM_LIMIT = 32 * 1024 * 1024  # safe scoped-VMEM budget on v5e/v6e/v7x


# ----------------------------------------------------------------------------
# Broadcast (tile-language) path: x1 (B,C,H,W) * x2 (C,)
# ----------------------------------------------------------------------------
def _broadcast_mult_pallas(x1_nchw, x2_vec):
    B, C, H, W = x1_nchw.shape
    R, L = B * C, H * W

    # Free reshape (no transpose): NCHW contiguous -> (B*C, H*W).
    x1_rows = x1_nchw.reshape(R, L)
    # Tiny (B*C, 1) column: row r uses channel r % C.  Cast hoisted out of the
    # kernel; the expansion is B*C elements -> negligible HBM traffic.
    x2_col = jnp.tile(x2_vec.astype(x1_rows.dtype), B).reshape(R, 1)

    tr = _tile(R, 1024, 8)     # rows (sublane-aligned)
    tl = _tile(L, 512, 128)    # lanes (>=128-dense)
    grid = (pl.cdiv(R, tr), pl.cdiv(L, tl))

    out_rows = pl.pallas_call(
        _fuse_broadcast_kernel,
        out_shape=jax.ShapeDtypeStruct((R, L), x1_rows.dtype),
        grid_spec=pltpu.PrefetchScalarGridSpec(
            num_scalar_prefetch=0,
            grid=grid,
            in_specs=[
                pl.BlockSpec((tr, tl), lambda i, j: (i, j)),
                pl.BlockSpec((tr, 1), lambda i, j: (i, 0)),
            ],
            out_specs=pl.BlockSpec((tr, tl), lambda i, j: (i, j)),
        ),
        compiler_params=pltpu.CompilerParams(
            dimension_semantics=("parallel", "parallel"),
            vmem_limit_bytes=_VMEM_LIMIT,
        ),
    )(x1_rows, x2_col)

    # Free reshape back to NCHW.
    return out_rows.reshape(B, C, H, W)


# ----------------------------------------------------------------------------
# Same-shape elementwise path
# ----------------------------------------------------------------------------
def _elementwise_mult_pallas(x1, x2):
    orig_shape = x1.shape
    total = 1
    for d in orig_shape:
        total *= d

    # Lane-dense flatten: pick the widest lane dim that divides the total.
    lane = next((l for l in (1024, 512, 256, 128) if total % l == 0), None)
    if lane is None:
        lane = orig_shape[-1]          # rare fallback: keep last dim on lanes
    rows = total // lane

    a = x1.reshape(rows, lane)
    b = x2.reshape(rows, lane)
    out_dtype = jnp.result_type(x1.dtype, x2.dtype)

    tr = _tile(rows, 1024, 8)
    tl = _tile(lane, 1024, 128)
    grid = (pl.cdiv(rows, tr), pl.cdiv(lane, tl))

    out = pl.pallas_call(
        _fuse_elementwise_kernel,
        out_shape=jax.ShapeDtypeStruct((rows, lane), out_dtype),
        grid_spec=pltpu.PrefetchScalarGridSpec(
            num_scalar_prefetch=0,
            grid=grid,
            in_specs=[
                pl.BlockSpec((tr, tl), lambda i, j: (i, j)),
                pl.BlockSpec((tr, tl), lambda i, j: (i, j)),
            ],
            out_specs=pl.BlockSpec((tr, tl), lambda i, j: (i, j)),
        ),
        compiler_params=pltpu.CompilerParams(
            dimension_semantics=("parallel", "parallel"),
            vmem_limit_bytes=_VMEM_LIMIT,
        ),
    )(a, b)
    return out.reshape(orig_shape)


# ----------------------------------------------------------------------------
# Public API (matches FusionMult.forward)
# ----------------------------------------------------------------------------
def fusion_mult(x1, x2, x2_mask=None, x2_proj=None):
    """JAX/Pallas equivalent of FusionMult.forward.

    x1: (B, C, H, W) NCHW visual features.
    x2: (C,) / (1, C) language features (tile path) or same shape as x1.
    x2_proj: optional callable applied to x2 before tiling (plain-JAX glue).
    """
    # TODO(synk): x2_mask is unused in the reference forward; kept for API parity.
    if x1.shape != x2.shape and len(x1.shape) != len(x2.shape):
        if x2_proj is not None:
            x2 = x2_proj(x2)
        x2 = x2.reshape(-1)  # (C,)
        return _broadcast_mult_pallas(x1, x2)
    if x1.shape != x2.shape:
        # Rank-equal but shape-different (e.g. (B,C,1,1)): numpy-style broadcast
        # then elementwise multiply (rare path, matches torch's `x1 * x2`).
        shape = jnp.broadcast_shapes(x1.shape, x2.shape)
        x1 = jnp.broadcast_to(x1, shape)
        x2 = jnp.broadcast_to(x2, shape)
    return _elementwise_mult_pallas(x1, x2)


if __name__ == "__main__":
    key = jax.random.PRNGKey(0)
    k1, k2, k3, k4, k5 = jax.random.split(key, 5)

    B, C, H, W = 2, 4, 16, 16
    x1 = jax.random.normal(k1, (B, C, H, W), dtype=jnp.float32)
    x2 = jax.random.normal(k2, (C,), dtype=jnp.float32)

    # Tile/broadcast path (rank mismatch, like lang features in CLIPort).
    out = jax.block_until_ready(fusion_mult(x1, x2))
    ref = x1 * x2.reshape(1, C, 1, 1)
    assert out.shape == (B, C, H, W)
    assert jnp.allclose(out, ref, atol=1e-6), "broadcast path mismatch"

    # Same-shape path (plain elementwise multiply).
    x2_full = jax.random.normal(k3, (B, C, H, W), dtype=jnp.float32)
    out2 = jax.block_until_ready(fusion_mult(x1, x2_full))
    assert jnp.allclose(out2, x1 * x2_full, atol=1e-6), "elementwise path mismatch"

    # Broadcast path with lane tiling + boundary masking (H*W > lane tile,
    # not a multiple of the 512-lane tile).
    Bb, Cb, Hb, Wb = 2, 3, 48, 48
    y1 = jax.random.normal(k4, (Bb, Cb, Hb, Wb), dtype=jnp.float32)
    y2 = jax.random.normal(k5, (Cb,), dtype=jnp.float32)
    out3 = jax.block_until_ready(fusion_mult(y1, y2))
    ref3 = y1 * y2.reshape(1, Cb, 1, 1)
    assert jnp.allclose(out3, ref3, atol=1e-6), "tiled broadcast path mismatch"

    print("KERNEL_OK")
</pallas_src>

<mosaic_0001>
module attributes {stable_mosaic.version = 11 : i64} {
  func.func @_fuse_broadcast_kernel(%arg0: i32, %arg1: i32, %arg2: memref<8x256xf32, #tpu.memory_space<vmem>>, %arg3: memref<8x1xf32, #tpu.memory_space<vmem>>, %arg4: memref<8x256xf32, #tpu.memory_space<vmem>>) attributes {dimension_semantics = [#tpu.dimension_semantics<parallel>, #tpu.dimension_semantics<parallel>], iteration_bounds = array<i64: 1, 1>, scalar_prefetch = 0 : i64, scratch_operands = 0 : i64, tpu.core_type = #tpu.core_type<tc>, window_params = [{transform_indices = @transform_0, window_bounds = array<i64: 8, 256>}, {transform_indices = @transform_1, window_bounds = array<i64: 8, 1>}, {transform_indices = @transform_2, window_bounds = array<i64: 8, 256>}]} {
    %c0 = arith.constant 0 : index
    %c0_0 = arith.constant 0 : index
    %0 = vector.load %arg2[%c0, %c0_0] : memref<8x256xf32, #tpu.memory_space<vmem>>, vector<8x256xf32>
    %c0_1 = arith.constant 0 : index
    %c0_2 = arith.constant 0 : index
    %1 = vector.load %arg3[%c0_1, %c0_2] : memref<8x1xf32, #tpu.memory_space<vmem>>, vector<8x1xf32>
    %2 = vector.broadcast %1 : vector<8x1xf32> to vector<8x256xf32>
    %3 = arith.mulf %0, %2 : vector<8x256xf32>
    %c0_3 = arith.constant 0 : index
    %c0_4 = arith.constant 0 : index
    %4 = vector.load %arg4[%c0_3, %c0_4] : memref<8x256xf32, #tpu.memory_space<vmem>>, vector<8x256xf32>
    tpu.vector_store %arg4[%c0_3, %c0_4], %3 {strides = array<i32>} : memref<8x256xf32, #tpu.memory_space<vmem>>, vector<8x256xf32>,
    return
  }
  func.func @transform_0(%arg0: i32, %arg1: i32) -> (i32, i32) {
    %c0_i32 = arith.constant 0 : i32
    return %arg0, %arg1 : i32, i32
  }
  func.func @transform_1(%arg0: i32, %arg1: i32) -> (i32, i32) {
    %c0_i32 = arith.constant 0 : i32
    %c0_i32_0 = arith.constant 0 : i32
    return %arg0, %c0_i32 : i32, i32
  }
  func.func @transform_2(%arg0: i32, %arg1: i32) -> (i32, i32) {
    %c0_i32 = arith.constant 0 : i32
    return %arg0, %arg1 : i32, i32
  }
}

</mosaic_0001>

<bundles_post_ra>
// kernel: tpu_custom_call.1
= control target key start
LH: loop header
LB: loop body
LE: loop exit
PB: predicated region body
PF: predicated region fallthrough
CT: control target
= control target key end

     0   :  { %7 = vsyncpa [#allocation3], 0  ;;  %s148_s0 = inlined_call_operand.hbm [shape: f32[8,256], index: 0, kind: input, shape index: {}]   ;;  %s149_s1 = inlined_call_operand.vmem [shape: f32[8,1], index: 1, kind: input, shape index: {}]   ;;  %s150_s2 = inlined_call_operand.hbm [shape: f32[8,256], index: 2, kind: output, shape index: {}]  }
   0x1   :  { %8 = vsyncpa [#allocation4], 0  ;;  %s103_s9 = smov [#allocation2]   ;;  %s55_s13 = scalar_lea.hbm %s148_s0, 256 }
   0x2   :  { %s15_s10 = sshll.u32 %s103_s9, 4  ;;  %p56_p0 = scmp.ne.s32.totalorder %s148_s0, %s55_s13  ;;  %s16_s10 = int_to_ptr.vmem [resolvable:$true] %s15_s10 }
   0x3   :  { %p59_p1 = scmp.lt.u32.totalorder %s55_s13, %s148_s0 }
   0x5   :  { %p61_p2 = pnand %p59_p1, %p56_p0 }
   0x7   :  { %64 = shalt.err (!%p61_p2)
}
   0x8   :  { %s65_s18 = scalar_lea.vmem %s16_s10, 256  ;;  %p70_p4 = scmp.lt.s32.totalorder %s16_s10, %s16_s10 }
   0x9   :  { %p66_p3 = scmp.ne.s32.totalorder %s16_s10, %s65_s18  ;;  %p71_p5 = scmp.lt.s32.totalorder %s65_s18, %s65_s18 }
   0xb   :  { %p72_p6 = por %p71_p5, %p70_p4 }
   0xd   :  { %p73_p7 = pnand %p72_p6, %p66_p3 }
   0xf   :  { %76 = shalt.err (!%p73_p7)
}
  0x10   :  { %18 = dma.hbm_to_vmem [thread:$0]  %s148_s0, 256, %s16_s10, [#allocation3]  }
  0x11   :  { %99 = dma.done.wait [#allocation3], 256  }
  0x12   :  { %100 = vsyncadd [#allocation3], 4294967040  ;;  %v104_v0 = vmov 0   ;;  %v26_v1 = vld [vmem:[%s149_s1] sm:$0xff]  ;;  %v25_v3 = vld [vmem:[#allocation2 + $0x8] sm:$0xff]  ;;  %s105_s23 = smov [#allocation5]  }
  0x13   :  { %54 = vset.pattern.permute.xlu0 %v104_v0  ;;  %v24_v2 = vld [vmem:[#allocation2] sm:$0xff]  ;;  %s42_s24 = sshll.u32 %s105_s23, 4  ;;  %s43_s24 = int_to_ptr.vmem [resolvable:$true] %s42_s24 }
  0x14   :  { %29 = vperm.xlu0 %54, %v26_v1   ;;  %s77_s0 = scalar_lea.vmem %s43_s24, 256  ;;  %p82_p9 = scmp.lt.s32.totalorder %s43_s24, %s43_s24 }
  0x15   :  { %p78_p8 = scmp.ne.s32.totalorder %s43_s24, %s77_s0  ;;  %p83_p10 = scmp.lt.s32.totalorder %s77_s0, %s77_s0 }
  0x17   :  { %p84_p11 = por %p83_p10, %p82_p9 }
  0x19   :  { %p85_p12 = pnand %p84_p11, %p78_p8 }
  0x93   :  { %v30_v4 = vpop.permute.xlu0 %29 }
  0x94   :  { %v32_v5 = vmul.f32 %v30_v4, %v24_v2  ;;  %v33_v6 = vmul.f32 %v30_v4, %v25_v3 }
  0x96   :  { %34 = vst [vmem:[#allocation5] sm:$0xff] %v32_v5  ;;  %35 = vst [vmem:[#allocation5 + $0x8] sm:$0xff] %v33_v6 }
  0x97   :  { %88 = shalt.err (!%p85_p12)
}
  0x98   :  { %s89_s26 = scalar_lea.hbm %s150_s2, 256 }
  0x99   :  { %p90_p13 = scmp.ne.s32.totalorder %s150_s2, %s89_s26  ;;  %p93_p0 = scmp.lt.u32.totalorder %s89_s26, %s150_s2 }
  0x9b   :  { %p95_p1 = pnand %p93_p0, %p90_p13 }
  0x9d   :  { %98 = shalt.err (!%p95_p1)
}
  0x9e   :  { %45 = dma.vmem_to_hbm [thread:$0]  %s43_s24, 256, %s150_s2, [#allocation4]  }
  0x9f   :  { %101 = dma.done.wait [#allocation4], 256  }
  0xa0   :  { %102 = vsyncadd [#allocation4], 4294967040 }
  0xa1   :  { %49 = vsyncpa [#allocation3], 1 }
  0xa2   :  { %50 = vsyncpa [#allocation4], 1 }

</bundles_post_ra>
